<compile_context>
chip_gen: v5e
topology: v5e:2x2
jax: 0.10.0
libtpu: 0.0.40
codegen_flags: <defaults>
</compile_context>

<pallas_src>
import functools
import math

import jax
import jax.numpy as jnp
from jax.experimental import pallas as pl
from jax.experimental.pallas import tpu as pltpu


_LANES = 512                     # fallback flat layout: lane-dense, unmasked stores
_LANE_ALIGN = 128                # fast-path requirement on the last dim
_MAX_TILE_BYTES = 2 * 1024 * 1024  # per-buffer block budget (8 MiB double-buffered)


def _sublane(dtype):
    """Sublane packing factor: 8 for 4-byte, 16 for 2-byte, 32 for 1-byte dtypes."""
    itemsize = jnp.dtype(dtype).itemsize
    return max(8, 32 // itemsize)


def _row_tile(rows, lanes, itemsize, sub):
    """Largest sublane-aligned row tile within the VMEM budget (or full rows)."""
    budget_rows = _MAX_TILE_BYTES // max(1, lanes * itemsize)
    budget_rows = max(sub, (budget_rows // sub) * sub)
    if rows <= budget_rows:
        return rows              # full-dim block: always a legal block shape
    return budget_rows


# ----------------------------------------------------------------------------
# Kernels
# ----------------------------------------------------------------------------
def _sine_plain_kernel(x_ref, o_ref, *, w0, finer):
    x = x_ref[...]
    if x.dtype != jnp.float32:       # skip the cast when already f32 (VALU win)
        x = x.astype(jnp.float32)
    if finer:
        # FINER: x * (|x| + 1); |x| of the detached x -> same forward value.
        x = x * (jnp.abs(x) + 1.0)
    o_ref[...] = jnp.sin(w0 * x).astype(o_ref.dtype)


def _sine_incode_kernel(a_ref, c_ref, x_ref, o_ref, *, w0, finer):
    # a_ref, c_ref: SMEM (N,) f32 scalar-prefetch tables (a = exp(p0), c = p0).
    i = pl.program_id(0)
    a = a_ref[i]                     # a == b == exp(p0)
    c = c_ref[i]                     # c == d == p0
    arg_scale = a * w0               # fold b * w0 once (scalar unit, free)

    x = x_ref[...]
    if x.dtype != jnp.float32:
        x = x.astype(jnp.float32)
    if finer:
        x = x * (jnp.abs(x) + 1.0)
    o_ref[...] = (a * jnp.sin(arg_scale * x + c) + c).astype(o_ref.dtype)


# ----------------------------------------------------------------------------
# Wrappers
# ----------------------------------------------------------------------------
def sine_plain(x, *, w0=30.0, finer=False, donate_x=False):
    """sin(w0 * x) (optionally FINER pre-scaled), any shape."""
    orig_shape = x.shape
    dtype = x.dtype
    itemsize = jnp.dtype(dtype).itemsize
    sub = _sublane(dtype)
    kernel = functools.partial(_sine_plain_kernel, w0=float(w0), finer=bool(finer))
    flops_per = (3 if finer else 0) + 1

    last = orig_shape[-1] if x.ndim >= 1 else 0
    aligned = (x.ndim >= 1 and last > 0 and last % _LANE_ALIGN == 0
               and last * itemsize * sub <= 4 * _MAX_TILE_BYTES)

    if aligned:
        # ---- exact-fit fast path: no pad, no slice (leading dims collapse is free)
        lanes = last
        rows = math.prod(orig_shape[:-1]) if x.ndim > 1 else 1
        x2 = x.reshape(rows, lanes)
        tile_rows = _row_tile(rows, lanes, itemsize, sub)
        grid = (pl.cdiv(rows, tile_rows),)
        total = rows * lanes
        out = pl.pallas_call(
            kernel,
            out_shape=jax.ShapeDtypeStruct((rows, lanes), dtype),
            grid_spec=pl.GridSpec(
                grid=grid,
                in_specs=[pl.BlockSpec((tile_rows, lanes), lambda i: (i, 0))],
                out_specs=pl.BlockSpec((tile_rows, lanes), lambda i: (i, 0)),
            ),
            compiler_params=pltpu.CompilerParams(dimension_semantics=("parallel",)),
            cost_estimate=pl.CostEstimate(
                flops=flops_per * total,
                transcendentals=total,
                bytes_accessed=2 * total * itemsize),
            input_output_aliases=({0: 0} if donate_x else {}),
        )(x2)
        return out.reshape(orig_shape)

    # ---- ragged fallback: flatten, pad to a whole number of 512-wide rows only
    n = x.size
    rows = pl.cdiv(n, _LANES)
    pad = rows * _LANES - n
    xf = jnp.pad(x.reshape(-1), (0, pad)).reshape(rows, _LANES)
    tile_rows = _row_tile(rows, _LANES, itemsize, sub)
    grid = (pl.cdiv(rows, tile_rows),)     # partial edge block is masked by Pallas
    total = rows * _LANES
    out = pl.pallas_call(
        kernel,
        out_shape=jax.ShapeDtypeStruct((rows, _LANES), dtype),
        grid_spec=pl.GridSpec(
            grid=grid,
            in_specs=[pl.BlockSpec((tile_rows, _LANES), lambda i: (i, 0))],
            out_specs=pl.BlockSpec((tile_rows, _LANES), lambda i: (i, 0)),
        ),
        compiler_params=pltpu.CompilerParams(dimension_semantics=("parallel",)),
        cost_estimate=pl.CostEstimate(
            flops=flops_per * total,
            transcendentals=total,
            bytes_accessed=2 * total * itemsize),
    )(xf)
    return out.reshape(-1)[:n].reshape(orig_shape)


def sine_incode(x, incode_params, *, w0=30.0, finer=False):
    """a*sin(b*w0*x + c) + d with per-decoder scalars; x shape (N, S, D)."""
    assert x.ndim == 3, "incode path implemented for the x.ndim == 3 case"
    N, S, D = x.shape
    assert incode_params.ndim == 2 and incode_params.shape[0] == N

    # Scalar tables stay f32 regardless of x.dtype (SMEM is a 32-bit path;
    # avoids bf16 precision loss in exp(p0)).
    p0 = incode_params[:, 0].astype(jnp.float32)
    a_vals = jnp.exp(p0)     # a == b
    c_vals = p0              # c == d

    dtype = x.dtype
    itemsize = jnp.dtype(dtype).itemsize
    sub = _sublane(dtype)
    kernel = functools.partial(_sine_incode_kernel, w0=float(w0), finer=bool(finer))
    flops_per = (3 if finer else 0) + 3
    cp = pltpu.CompilerParams(dimension_semantics=("parallel", "parallel"))

    aligned = (D % _LANE_ALIGN == 0 and D * itemsize * sub <= 4 * _MAX_TILE_BYTES)
    if aligned:
        # ---- exact-fit fast path: pass (N, S, D) through untouched
        tile_s = _row_tile(S, D, itemsize, sub)
        grid = (N, pl.cdiv(S, tile_s))
        total = N * S * D
        # TODO(synk): expose input_output_aliases here once the operand index
        #             convention with scalar-prefetch args is pinned down.
        return pl.pallas_call(
            kernel,
            out_shape=jax.ShapeDtypeStruct((N, S, D), dtype),
            grid_spec=pltpu.PrefetchScalarGridSpec(
                num_scalar_prefetch=2,                 # a_vals, c_vals -> SMEM
                grid=grid,
                in_specs=[pl.BlockSpec((1, tile_s, D),
                                       lambda i, j, a, c: (i, j, 0))],
                out_specs=pl.BlockSpec((1, tile_s, D),
                                       lambda i, j, a, c: (i, j, 0)),
            ),
            compiler_params=cp,
            cost_estimate=pl.CostEstimate(
                flops=flops_per * total,
                transcendentals=total,
                bytes_accessed=2 * total * itemsize),
        )(a_vals, c_vals, x)

    # ---- ragged fallback: per-decoder flatten, pad to whole 512-wide rows only
    n_per = S * D
    rows = pl.cdiv(n_per, _LANES)
    pad = rows * _LANES - n_per
    xf = jnp.pad(x.reshape(N, n_per), ((0, 0), (0, pad))).reshape(N, rows, _LANES)
    tile_rows = _row_tile(rows, _LANES, itemsize, sub)
    grid = (N, pl.cdiv(rows, tile_rows))   # partial edge block masked by Pallas
    total = N * rows * _LANES
    out = pl.pallas_call(
        kernel,
        out_shape=jax.ShapeDtypeStruct((N, rows, _LANES), dtype),
        grid_spec=pltpu.PrefetchScalarGridSpec(
            num_scalar_prefetch=2,
            grid=grid,
            in_specs=[pl.BlockSpec((1, tile_rows, _LANES),
                                   lambda i, j, a, c: (i, j, 0))],
            out_specs=pl.BlockSpec((1, tile_rows, _LANES),
                                   lambda i, j, a, c: (i, j, 0)),
        ),
        compiler_params=cp,
        cost_estimate=pl.CostEstimate(
            flops=flops_per * total,
            transcendentals=total,
            bytes_accessed=2 * total * itemsize),
    )(a_vals, c_vals, xf)
    return out.reshape(N, rows * _LANES)[:, :n_per].reshape(N, S, D)


class SinePallas:
    """JAX/Pallas port of SIEDD Sine activation."""

    def __init__(self, w0=30.0, c=6.0, finer=False, abcd=None, power=None):
        self.w0 = w0
        self.c = c
        self.finer = finer
        self.power = power
        self.abcd = abcd  # buffer, shape (N_decoders, 4) or None

    def __call__(self, x, incode_params=None, decoder_idx=None):
        if incode_params is None and self.abcd is not None:
            incode_params = self.abcd
        if incode_params is not None:
            # Mirror the PyTorch `.detach()` buffer update, but never store a
            # traced value (stateful side effects leak / go stale under jit).
            try:
                is_tracer = isinstance(incode_params, jax.core.Tracer)
            except Exception:
                is_tracer = False
            if not is_tracer:
                self.abcd = incode_params
            params = incode_params
            if decoder_idx is not None:
                params = params[decoder_idx]  # glue: decoder selection in JAX
            return sine_incode(x, params, w0=self.w0, finer=self.finer)
        return sine_plain(x, w0=self.w0, finer=self.finer)


# ----------------------------------------------------------------------------
# Reference (pure jnp) for sanity checking
# ----------------------------------------------------------------------------
def _ref_incode(x, incode_params, w0, finer):
    a = jnp.exp(incode_params[:, 0])[:, None, None]
    b = jnp.exp(incode_params[:, 0])[:, None, None]
    c = incode_params[:, 0][:, None, None]
    d = incode_params[:, 0][:, None, None]
    if finer:
        x = x * (jnp.abs(x) + 1.0)
    return a * jnp.sin(b * w0 * x + c) + d


def _ref_plain(x, w0, finer):
    if finer:
        x = x * (jnp.abs(x) + 1.0)
    return jnp.sin(w0 * x)


if __name__ == "__main__":
    key = jax.random.PRNGKey(0)
    k1, k2, k3, k4 = jax.random.split(key, 4)

    # --- plain SIREN activation, aligned fast path (last dim multiple of 128)
    x_fast = jax.random.normal(k1, (2, 8, 128), dtype=jnp.float32)
    sine = SinePallas(w0=30.0)
    out_fast = jax.block_until_ready(sine(x_fast))
    ref_fast = _ref_plain(x_fast, 30.0, False)
    assert out_fast.shape == x_fast.shape
    err = float(jnp.max(jnp.abs(out_fast - ref_fast)))
    assert err < 5e-4, f"plain fast-path max err {err}"

    # --- plain path, ragged fallback (last dim not a multiple of 128)
    x_rag = jax.random.normal(k2, (3, 5, 33), dtype=jnp.float32)
    out_rag = jax.block_until_ready(sine(x_rag))
    ref_rag = _ref_plain(x_rag, 30.0, False)
    assert out_rag.shape == x_rag.shape
    err = float(jnp.max(jnp.abs(out_rag - ref_rag)))
    assert err < 5e-4, f"plain ragged-path max err {err}"

    # --- INCODE path with per-decoder abcd params (+ FINER), aligned fast path
    N, S, D = 4, 16, 128
    x_inc = jax.random.normal(k3, (N, S, D), dtype=jnp.float32)
    abcd = 0.1 * jax.random.normal(k4, (N, 4), dtype=jnp.float32)
    sine_inc = SinePallas(w0=30.0, finer=True, abcd=abcd)
    out_inc = jax.block_until_ready(sine_inc(x_inc))
    ref_inc = _ref_incode(x_inc, abcd, 30.0, True)
    assert out_inc.shape == x_inc.shape
    # sin arguments reach O(500) with w0=30 + FINER; f32 range reduction
    # amplifies rounding error by ~|arg|*eps, so use a tolerance that absorbs
    # that while still catching real bugs.
    err = float(jnp.max(jnp.abs(out_inc - ref_inc)))
    assert err < 5e-3, f"incode fast-path max err {err}"

    # --- INCODE path, ragged fallback (D not a multiple of 128)
    x_inc2 = jax.random.normal(k3, (N, S, 32), dtype=jnp.float32)
    out_inc2 = jax.block_until_ready(sine_inc(x_inc2))
    ref_inc2 = _ref_incode(x_inc2, abcd, 30.0, True)
    assert out_inc2.shape == x_inc2.shape
    err = float(jnp.max(jnp.abs(out_inc2 - ref_inc2)))
    assert err < 5e-3, f"incode ragged-path max err {err}"

    print("KERNEL_OK")
</pallas_src>

<mosaic_0001>
module attributes {stable_mosaic.version = 11 : i64} {
  func.func @_sine_plain_kernel(%arg0: i32, %arg1: memref<16x128xf32, #tpu.memory_space<vmem>>, %arg2: memref<16x128xf32, #tpu.memory_space<vmem>>) attributes {dimension_semantics = [#tpu.dimension_semantics<parallel>], iteration_bounds = array<i64: 1>, scalar_prefetch = 0 : i64, scratch_operands = 0 : i64, tpu.core_type = #tpu.core_type<tc>, window_params = [{transform_indices = @transform_0, window_bounds = array<i64: 16, 128>}, {transform_indices = @transform_1, window_bounds = array<i64: 16, 128>}]} {
    %c0 = arith.constant 0 : index
    %c0_0 = arith.constant 0 : index
    %0 = vector.load %arg1[%c0, %c0_0] : memref<16x128xf32, #tpu.memory_space<vmem>>, vector<16x128xf32>
    %cst = arith.constant 3.000000e+01 : f32
    %1 = vector.broadcast %cst : f32 to vector<16x128xf32>
    %2 = arith.mulf %1, %0 : vector<16x128xf32>
    %3 = math.sin %2 : vector<16x128xf32>
    %c0_1 = arith.constant 0 : index
    %c0_2 = arith.constant 0 : index
    %4 = vector.load %arg2[%c0_1, %c0_2] : memref<16x128xf32, #tpu.memory_space<vmem>>, vector<16x128xf32>
    tpu.vector_store %arg2[%c0_1, %c0_2], %3 {strides = array<i32>} : memref<16x128xf32, #tpu.memory_space<vmem>>, vector<16x128xf32>,
    return
  }
  func.func @transform_0(%arg0: i32) -> (i32, i32) {
    %c0_i32 = arith.constant 0 : i32
    %c0_i32_0 = arith.constant 0 : i32
    return %arg0, %c0_i32 : i32, i32
  }
  func.func @transform_1(%arg0: i32) -> (i32, i32) {
    %c0_i32 = arith.constant 0 : i32
    %c0_i32_0 = arith.constant 0 : i32
    return %arg0, %c0_i32 : i32, i32
  }
}

</mosaic_0001>

<bundles_post_ra>
// kernel: tpu_custom_call.1
= control target key start
LH: loop header
LB: loop body
LE: loop exit
PB: predicated region body
PF: predicated region fallthrough
CT: control target
= control target key end

     0   :  { %6 = vsyncpa [#allocation3], 0  ;;  %s635_s0 = inlined_call_operand.hbm [shape: f32[16,128], index: 0, kind: input, shape index: {}]   ;;  %s636_s1 = inlined_call_operand.hbm [shape: f32[16,128], index: 1, kind: output, shape index: {}]  }
   0x1   :  { %7 = vsyncpa [#allocation4], 0  ;;  %s12_s8 = sshll.u32 %s635_s0, 4  ;;  %s429_s9 = smov [#allocation2]   ;;  %s13_s8 = int_to_ptr.hbm [resolvable:$true] %s12_s8 }
   0x2   :  { %s14_s10 = sshll.u32 %s429_s9, 4  ;;  %s430_s11 = smov 128   ;;  %s15_s10 = int_to_ptr.vmem [resolvable:$true] %s14_s10 }
   0x3   :  { %s431_s12 = smov 8  }
   0x4   :  { %20 = dma.hbm_to_vmem [thread:$0]  %s13_s8, 256, %s15_s10, [#allocation3], %s430_s11, %s430_s11, %s431_s12  }
   0x5   :  { %425 = dma.done.wait [#allocation3], 256  }
   0x6   :  { %426 = vsyncadd [#allocation3], 4294967040  ;;  %v25_v0 = vld [vmem:[#allocation2] sm:$0xff]  ;;  %v26_v1 = vld [vmem:[#allocation2 + $0x8] sm:$0xff]  ;;  %v432_v25 = vmov 683565275  }
   0x7   :  { %v456_v2 = vmul.f32 30.0, %v25_v0  ;;  %v458_v3 = vmul.f32 30.0, %v26_v1  ;;  %v433_v27 = vmov 2475754826   ;;  %v434_v29 = vmov 2131351028  }
   0x8   :  { %v435_v31 = vmov 2102212464   ;;  %v436_v33 = vmov 920167782   ;;  %v437_v42 = vmov 1326507024  }
   0x9   :  { %v29_v4 = vand.u32 2147483647, %v456_v2  ;;  %v32_v5 = vand.u32 2139095040, %v456_v2  ;;  %v184_v6 = vand.u32 2147483647, %v458_v3  ;;  %v187_v7 = vand.u32 2139095040, %v458_v3 }
   0xa   :  { %s439_s0 = smov [#allocation5]   ;;  %s347_s16 = sshll.u32 %s636_s1, 4  ;;  %s348_s16 = int_to_ptr.hbm [resolvable:$true] %s347_s16 }
   0xb   :  { %v33_v8 = vshrl.u32 %v32_v5, 23  ;;  %v36_v9 = vand.u32 8388607, %v29_v4  ;;  %v188_v10 = vshrl.u32 %v187_v7, 23  ;;  %v191_v14 = vand.u32 8388607, %v184_v6 }
   0xc   :  { %s345_s13 = sshll.u32 %s439_s0, 4  ;;  %s346_s13 = int_to_ptr.vmem [resolvable:$true] %s345_s13 }
   0xd   :  { %v360_v11 = vadd.s32 4294967169, %v33_v8  ;;  %v37_v12 = vor.u32 8388608, %v36_v9  ;;  %v363_v13 = vadd.s32 4294967169, %v188_v10  ;;  %v192_v19 = vor.u32 8388608, %v191_v14 }
   0xf   :  { %v39_v15 = vadd.s32 1, %v360_v11  ;;  %v194_v16 = vadd.s32 1, %v363_v13  ;;  %v468_v18 = vshll.u32 %v37_v12, 8  ;;  %v478_v36 = vshll.u32 %v192_v19, 8 }
  0x11   :  { %vm40_vm0 = vcmp.gt.s32.totalorder %v39_v15, 0  ;;  %vm195_vm1 = vcmp.gt.s32.totalorder %v194_v16, 0  ;;  %v78_v35 = vand.u32 65535, %v468_v18  ;;  %v79_v40 = vshrl.u32 %v468_v18, 16 }
  0x12   :  { %v41_v17 = vsel %vm40_vm0, %v39_v15, 0  ;;  %v196_v21 = vsel %vm195_vm1, %v194_v16, 0 }
  0x13   :  { %v43_v20 = vand.u32 31, %v41_v17  ;;  %v470_v22 = vshrl.u32 %v41_v17, 5  ;;  %v472_v23 = vand.u32 31, %v196_v21  ;;  %v496_v53 = vshrl.u32 %v196_v21, 5 }
  0x15   :  { %v44_v24 = vsub.s32 32, %v43_v20  ;;  %v46_v26 = vshll.u32 %v432_v25, %v43_v20  ;;  %v49_v28 = vshll.u32 %v433_v27, %v43_v20  ;;  %v52_v30 = vshll.u32 %v434_v29, %v43_v20 }
  0x16   :  { %v55_v32 = vshll.u32 %v435_v31, %v43_v20  ;;  %v58_v34 = vshll.u32 %v436_v33, %v43_v20  ;;  %vm61_vm2 = vcmp.lt.s32.totalorder %v470_v22, 1  ;;  %vm64_vm3 = vcmp.lt.s32.totalorder %v470_v22, 4 }
  0x17   :  { %v47_v37 = vshrl.u32 %v433_v27, %v44_v24  ;;  %v50_v38 = vshrl.u32 %v434_v29, %v44_v24  ;;  %v53_v39 = vshrl.u32 %v435_v31, %v44_v24  ;;  %v56_v41 = vshrl.u32 %v436_v33, %v44_v24 }
  0x18   :  { %v59_v43 = vshrl.u32 %v437_v42, %v44_v24  ;;  %v487_v47 = vsub.s32 32, %v472_v23  ;;  %v45_v48 = vshrl.u32 %v432_v25, %v44_v24  ;;  %vm63_vm4 = vcmp.lt.s32.totalorder %v470_v22, 3 }
  0x19   :  { %v48_v44 = vor.u32 %v47_v37, %v46_v26  ;;  %v51_v45 = vor.u32 %v50_v38, %v49_v28  ;;  %v54_v46 = vor.u32 %v53_v39, %v52_v30  ;;  %v57_v49 = vor.u32 %v56_v41, %v55_v32 }
  0x1a   :  { %v60_v50 = vor.u32 %v59_v43, %v58_v34  ;;  %vm62_vm5 = vcmp.lt.s32.totalorder %v470_v22, 2  ;;  %v201_v56 = vshll.u32 %v432_v25, %v472_v23  ;;  %v204_v57 = vshll.u32 %v433_v27, %v472_v23 }
  0x1b   :  { %v69_v51 = vsel %vm61_vm2, %v48_v44, %v51_v45  ;;  %v73_v52 = vsel %vm61_vm2, %v51_v45, %v54_v46  ;;  %v70_v54 = vsel %vm64_vm3, %v57_v49, 920167782  ;;  %v66_v58 = vsel %vm64_vm3, %v54_v46, 2102212464 }
  0x1c   :  { %v74_v55 = vsel %vm64_vm3, %v60_v50, 1326507024  ;;  %v71_v59 = vsel %vm63_vm4, %v54_v46, %v70_v54  ;;  %v202_v61 = vshrl.u32 %v433_v27, %v487_v47  ;;  %v65_v62 = vsel %vm61_vm2, %v45_v48, %v48_v44 }
  0x1d   :  { %v75_v60 = vsel %vm63_vm4, %v57_v49, %v74_v55  ;;  %v72_v63 = vsel %vm62_vm5, %v69_v51, %v71_v59  ;;  %v205_v1 = vshrl.u32 %v434_v29, %v487_v47  ;;  %v67_v10 = vsel %vm63_vm4, %v51_v45, %v66_v58 }
  0x1e   :  { %v76_v0 = vsel %vm62_vm5, %v73_v52, %v75_v60  ;;  %v102_v8 = vand.u32 65535, %v72_v63  ;;  %v103_v9 = vshrl.u32 %v72_v63, 16  ;;  %v521_v11 = vor.u32 %v202_v61, %v201_v56 }
  0x1f   :  { %v80_v5 = vand.u32 65535, %v76_v0  ;;  %v81_v7 = vshrl.u32 %v76_v0, 16  ;;  %v523_v12 = vor.u32 %v205_v1, %v204_v57  ;;  %v207_v13 = vshll.u32 %v434_v29, %v472_v23 }
  0x20   :  { %v208_v17 = vshrl.u32 %v435_v31, %v487_v47  ;;  %v104_v20 = vmul.u32 %v102_v8, %v78_v35  ;;  %v105_v21 = vmul.u32 %v103_v9, %v78_v35  ;;  %v106_v24 = vmul.u32 %v102_v8, %v79_v40 }
  0x21   :  { %v82_v14 = vmul.u32 %v80_v5, %v78_v35  ;;  %v83_v15 = vmul.u32 %v81_v7, %v78_v35  ;;  %v84_v16 = vmul.u32 %v80_v5, %v79_v40  ;;  %v85_v19 = vmul.u32 %v81_v7, %v79_v40 }
  0x22   :  { %v107_v30 = vmul.u32 %v103_v9, %v79_v40  ;;  %v108_v34 = vshll.u32 %v105_v21, 16  ;;  %v109_v37 = vshrl.u32 %v105_v21, 16  ;;  %v110_v38 = vshll.u32 %v106_v24, 16 }
  0x23   :  { %v86_v26 = vshll.u32 %v83_v15, 16  ;;  %v87_v27 = vshrl.u32 %v83_v15, 16  ;;  %v88_v28 = vshll.u32 %v84_v16, 16  ;;  %v89_v32 = vshrl.u32 %v84_v16, 16 }
  0x24   :  { %v111_v39 = vshrl.u32 %v106_v24, 16  ;;  %v210_v41 = vshll.u32 %v435_v31, %v472_v23  ;;  %v438_v43 = vmov 0   ;;  %vm112_vm7 = vc.u32 %v104_v20, %v108_v34 }
  0x25   :  { %vm90_vm6 = vc.u32 %v82_v14, %v86_v26  ;;  %v92_v29 = vadd.s32 %v86_v26, %v82_v14  ;;  %v114_v35 = vadd.s32 %v108_v34, %v104_v20  ;;  %v211_v45 = vshrl.u32 %v436_v33, %v487_v47 }
  0x26   :  { %v91_v44 = vsel %vm90_vm6, 1, %v438_v43  ;;  %v113_v40 = vsel %vm112_vm7, 1, %v438_v43  ;;  %v213_v48 = vshll.u32 %v436_v33, %v472_v23  ;;  %v209_v31 = vor.u32 %v208_v17, %v207_v13 }
  0x27   :  { %v93_v46 = vadd.s32 %v91_v44, %v85_v19  ;;  %vm94_vm8 = vc.u32 %v92_v29, %v88_v28  ;;  %v115_v50 = vadd.s32 %v113_v40, %v107_v30  ;;  %vm116_vm9 = vc.u32 %v114_v35, %v110_v38 }
  0x28   :  { %v95_v49 = vsel %vm94_vm8, 1, %v438_v43  ;;  %v117_v52 = vsel %vm116_vm9, 1, %v438_v43  ;;  %v212_v54 = vor.u32 %v211_v45, %v210_v41  ;;  %v214_v55 = vshrl.u32 %v437_v42, %v487_v47 }
  0x29   :  { %v97_v51 = vadd.s32 %v95_v49, %v93_v46  ;;  %v540_v56 = vadd.s32 %v114_v35, %v110_v38  ;;  %v119_v57 = vadd.s32 %v117_v52, %v115_v50  ;;  %vm216_vm10 = vcmp.lt.s32.totalorder %v496_v53, 1 }
  0x2a   :  { %vm218_vm11 = vcmp.lt.s32.totalorder %v496_v53, 3  ;;  %v215_v33 = vor.u32 %v214_v55, %v213_v48  ;;  %vm217_vm12 = vcmp.lt.s32.totalorder %v496_v53, 2  ;;  %vm219_vm13 = vcmp.lt.s32.totalorder %v496_v53, 4 }
  0x2b   :  { %v98_v23 = vadd.s32 %v97_v51, %v87_v27  ;;  %v68_v58 = vsel %vm62_vm5, %v65_v62, %v67_v10  ;;  %v120_v59 = vadd.s32 %v119_v57, %v109_v37  ;;  %v224_v42 = vsel %vm216_vm10, %v521_v11, %v523_v12 }
  0x2c   :  { %v225_v60 = vsel %vm219_vm13, %v212_v54, 920167782  ;;  %v228_v0 = vsel %vm216_vm10, %v523_v12, %v209_v31  ;;  %v233_v22 = vand.u32 65535, %v478_v36  ;;  %v229_v5 = vsel %vm219_vm13, %v215_v33, 1326507024 }
  0x2d   :  { %v554_v61 = vadd.s32 %v98_v23, %v89_v32  ;;  %v226_v63 = vsel %vm218_vm11, %v209_v31, %v225_v60  ;;  %v121_v62 = vadd.s32 %v120_v59, %v111_v39  ;;  %v234_v7 = vshrl.u32 %v478_v36, 16 }
  0x2e   :  { %v227_v1 = vsel %vm217_vm12, %v224_v42, %v226_v63  ;;  %v122_v8 = vmul.u32 %v468_v18, %v68_v58  ;;  %v230_v9 = vsel %vm218_vm11, %v212_v54, %v229_v5  ;;  %v200_v20 = vshrl.u32 %v432_v25, %v487_v47 }
  0x2f   :  { %vm124_vm14 = vc.u32 %v554_v61, %v540_v56  ;;  %v257_v10 = vand.u32 65535, %v227_v1  ;;  %v125_v13 = vadd.s32 1, %v121_v62  ;;  %v231_v14 = vsel %vm217_vm12, %v228_v0, %v230_v9 }
  0x30   :  { %v258_v15 = vshrl.u32 %v227_v1, 16  ;;  %v235_v16 = vand.u32 65535, %v231_v14  ;;  %v236_v17 = vshrl.u32 %v231_v14, 16  ;;  %v221_v37 = vsel %vm219_vm13, %v209_v31, 2102212464 }
  0x31   :  { %v126_v19 = vsel %vm124_vm14, %v125_v13, %v121_v62  ;;  %v261_v18 = vmul.u32 %v257_v10, %v234_v7  ;;  %v259_v28 = vmul.u32 %v257_v10, %v233_v22  ;;  %v220_v39 = vsel %vm216_vm10, %v200_v20, %v521_v11 }
  0x32   :  { %v260_v21 = vmul.u32 %v258_v15, %v233_v22  ;;  %v127_v24 = vadd.s32 %v126_v19, %v122_v8  ;;  %v237_v26 = vmul.u32 %v235_v16, %v233_v22  ;;  %v238_v27 = vmul.u32 %v236_v17, %v233_v22 }
  0x33   :  { %v239_v30 = vmul.u32 %v235_v16, %v234_v7  ;;  %v240_v38 = vmul.u32 %v236_v17, %v234_v7  ;;  %v262_v25 = vmul.u32 %v258_v15, %v234_v7  ;;  %v265_v47 = vshll.u32 %v261_v18, 16 }
  0x34   :  { %v263_v32 = vshll.u32 %v260_v21, 16  ;;  %v128_v34 = vadd.s32 536870912, %v127_v24  ;;  %v241_v29 = vshll.u32 %v238_v27, 16  ;;  %v222_v45 = vsel %vm218_vm11, %v523_v12, %v221_v37 }
  0x35   :  { %v243_v41 = vshll.u32 %v239_v30, 16  ;;  %v242_v11 = vshrl.u32 %v238_v27, 16  ;;  %v264_v51 = vshrl.u32 %v260_v21, 16  ;;  %v244_v55 = vshrl.u32 %v239_v30, 16 }
  0x36   :  { %v581_v44 = vshrl.u32 %v128_v34, 30  ;;  %vm245_vm15 = vc.u32 %v237_v26, %v241_v29  ;;  %v247_v35 = vadd.s32 %v241_v29, %v237_v26  ;;  %vm267_vm0 = vc.u32 %v259_v28, %v263_v32 }
  0x37   :  { %v246_v46 = vsel %vm245_vm15, 1, %v438_v43  ;;  %v268_v40 = vsel %vm267_vm0, 1, %v438_v43  ;;  %v269_v48 = vadd.s32 %v263_v32, %v259_v28  ;;  %v266_v23 = vshrl.u32 %v261_v18, 16 }
  0x38   :  { %v130_v49 = vshll.u32 %v581_v44, 30  ;;  %v248_v50 = vadd.s32 %v246_v46, %v240_v38  ;;  %vm249_vm1 = vc.u32 %v247_v35, %v243_v41  ;;  %v270_v52 = vadd.s32 %v268_v40, %v262_v25 }
  0x39   :  { %v250_v31 = vsel %vm249_vm1, 1, %v438_v43  ;;  %vm271_vm2 = vc.u32 %v269_v48, %v265_v47  ;;  %v273_v42 = vadd.s32 %v269_v48, %v265_v47  ;;  %v223_v60 = vsel %vm217_vm12, %v220_v39, %v222_v45 }
  0x3a   :  { %v131_v54 = vsub.s32 %v127_v24, %v130_v49  ;;  %v252_v57 = vadd.s32 %v250_v31, %v248_v50  ;;  %v272_v12 = vsel %vm271_vm2, 1, %v438_v43  ;;  %v277_v5 = vmul.u32 %v478_v36, %v223_v60 }
  0x3b   :  { %v274_v33 = vadd.s32 %v272_v12, %v270_v52  ;;  %v123_v43 = vadd.s32 %v540_v56, %v554_v61  ;;  %v153_v30 = vsub.s32 4, %v581_v44  ;;  %vm31_vm7 = vcmp.lt.s32.totalorder %v456_v2, 0 }
  0x3c   :  { %vm132_vm3 = vcmp.lt.s32.totalorder %v131_v54, 0  ;;  %v133_v58 = vsub.s32 0, %v131_v54  ;;  %v253_v59 = vadd.s32 %v252_v57, %v242_v11  ;;  %vm603_vm8 = vcmp.le.f32.partialorder %v29_v4, 0.7853982 }
  0x3d   :  { %v275_v63 = vadd.s32 %v274_v33, %v264_v51  ;;  %v154_v39 = vsel %vm31_vm7, %v153_v30, %v581_v44  ;;  %vm186_vm11 = vcmp.lt.s32.totalorder %v458_v3, 0  ;;  %vm617_vm13 = vcmp.le.f32.partialorder %v184_v6, 0.7853982 }
  0x3e   :  { %v134_v0 = vsel %vm132_vm3, %v133_v58, %v131_v54  ;;  %v254_v22 = vadd.s32 %v253_v59, %v244_v55  ;;  %v156_v45 = vsel %vm603_vm8, 0, %v154_v39  ;;  %vm172_vm15 = vweird.f32 %v456_v2 }
  0x3f   :  { %v135_v62 = vclz %v134_v0  ;;  %v276_v1 = vadd.s32 %v275_v63, %v266_v23  ;;  %v173_v51 = vadd.s32 3, %v156_v45  ;;  %vm327_vm3 = vweird.f32 %v458_v3 }
  0x40   :  { %vm279_vm4 = vc.u32 %v254_v22, %v273_v42  ;;  %v278_v35 = vadd.s32 %v273_v42, %v254_v22 }
  0x41   :  { %v361_v7 = vadd.s32 4294967294, %v135_v62  ;;  %v280_v8 = vadd.s32 1, %v276_v1  ;;  %v174_v58 = vand.u32 3, %v173_v51 }
  0x43   :  { %vm362_vm5 = vcmp.lt.s32.totalorder %v361_v7, 0  ;;  %v281_v9 = vsel %vm279_vm4, %v280_v8, %v276_v1  ;;  %vm179_vm10 = vcmp.eq.s32.totalorder %v174_v58, 2  ;;  %vm176_vm12 = vcmp.eq.s32.totalorder %v174_v58, 0 }
  0x44   :  { %v138_v10 = vsel %vm362_vm5, 0, %v361_v7  ;;  %v282_v13 = vadd.s32 %v281_v9, %v277_v5  ;;  %vm175_vm14 = vcmp.lt.s32.totalorder %v174_v58, 2 }
  0x45   :  { %v139_v14 = vsub.s32 32, %v138_v10  ;;  %v140_v53 = vshll.u32 %v131_v54, %v138_v10  ;;  %v143_v15 = vsub.s32 4294967266, %v138_v10 }
  0x46   :  { %v283_v16 = vadd.s32 536870912, %v282_v13 }
  0x47   :  { %v141_v17 = vshrl.u32 %v123_v43, %v139_v14  ;;  %v144_v19 = vadd.s32 127, %v143_v15 }
  0x48   :  { %v596_v20 = vshrl.u32 %v283_v16, 30 }
  0x49   :  { %v142_v21 = vor.u32 %v141_v17, %v140_v53  ;;  %v145_v36 = vshll.u32 %v144_v19, 23 }
  0x4a   :  { %v285_v18 = vshll.u32 %v596_v20, 30  ;;  %v308_v8 = vsub.s32 4, %v596_v20 }
  0x4b   :  { %v146_v24 = vor.u32 4788187, %v145_v36  ;;  %v149_v26 = vcvt.s32.f32 %v142_v21 }
  0x4c   :  { %v286_v27 = vsub.s32 %v282_v13, %v285_v18  ;;  %v309_v15 = vsel %vm186_vm11, %v308_v8, %v596_v20 }
  0x4d   :  { %v147_v56 = vand.u32 2147483647, %v146_v24  ;;  %v311_v21 = vsel %vm617_vm13, 0, %v309_v15 }
  0x4e   :  { %vm287_vm6 = vcmp.lt.s32.totalorder %v286_v27, 0  ;;  %v288_v61 = vsub.s32 0, %v286_v27 }
  0x4f   :  { %v150_v28 = vmul.f32 %v149_v26, %v147_v56 }
  0x50   :  { %v289_v32 = vsel %vm287_vm6, %v288_v61, %v286_v27 }
  0x51   :  { %v151_v37 = vxor.u32 2147483648, %v150_v28  ;;  %v290_v38 = vclz %v289_v32 }
  0x53   :  { %v152_v29 = vsel %vm31_vm7, %v151_v37, %v150_v28  ;;  %v364_v41 = vadd.s32 4294967294, %v290_v38 }
  0x54   :  { %v155_v25 = vsel %vm603_vm8, %v456_v2, %v152_v29  ;;  %v328_v2 = vadd.s32 3, %v311_v21 }
  0x55   :  { %v157_v47 = vmul.f32 %v155_v25, %v155_v25  ;;  %vm365_vm9 = vcmp.lt.s32.totalorder %v364_v41, 0 }
  0x56   :  { %v293_v4 = vsel %vm365_vm9, 0, %v364_v41  ;;  %v329_v28 = vand.u32 3, %v328_v2 }
  0x57   :  { %v158_v46 = vmul.f32 -0.001358992, %v157_v47  ;;  %v165_v40 = vmul.f32 -0.00019511016, %v157_v47  ;;  %v294_v48 = vsub.s32 32, %v293_v4  ;;  %v295_v49 = vshll.u32 %v286_v27, %v293_v4 }
  0x58   :  { %v298_v11 = vsub.s32 4294967266, %v293_v4  ;;  %vm334_vm0 = vcmp.eq.s32.totalorder %v329_v28, 2  ;;  %vm331_vm1 = vcmp.eq.s32.totalorder %v329_v28, 0  ;;  %vm330_vm2 = vcmp.lt.s32.totalorder %v329_v28, 2 }
  0x59   :  { %v159_v50 = vadd.f32 0.041655596, %v158_v46  ;;  %v166_v31 = vadd.f32 0.008332121, %v165_v40  ;;  %v296_v44 = vshrl.u32 %v278_v35, %v294_v48 }
  0x5a   :  { %v299_v52 = vadd.s32 127, %v298_v11 }
  0x5b   :  { %v160_v54 = vmul.f32 %v159_v50, %v157_v47  ;;  %v167_v55 = vmul.f32 %v166_v31, %v157_v47  ;;  %v297_v57 = vor.u32 %v296_v44, %v295_v49 }
  0x5c   :  { %v300_v12 = vshll.u32 %v299_v52, 23 }
  0x5d   :  { %v161_v23 = vadd.f32 -0.4999988, %v160_v54  ;;  %v168_v33 = vadd.f32 -0.16666654, %v167_v55  ;;  %v304_v42 = vcvt.s32.f32 %v297_v57 }
  0x5e   :  { %v301_v59 = vor.u32 4788187, %v300_v12 }
  0x5f   :  { %v162_v60 = vmul.f32 %v161_v23, %v157_v47  ;;  %v169_v63 = vmul.f32 %v168_v33, %v157_v47 }
  0x60   :  { %v302_v0 = vand.u32 2147483647, %v301_v59 }
  0x61   :  { %v163_v22 = vadd.f32 1.0, %v162_v60  ;;  %v170_v62 = vadd.f32 1.0, %v169_v63 }
  0x62   :  { %v305_v1 = vmul.f32 %v304_v42, %v302_v0 }
  0x63   :  { %v171_v5 = vmul.f32 %v170_v62, %v155_v25  ;;  %v180_v7 = vxor.u32 2147483648, %v163_v22 }
  0x64   :  { %v306_v9 = vxor.u32 2147483648, %v305_v1 }
  0x65   :  { %v177_v10 = vxor.u32 2147483648, %v171_v5  ;;  %v181_v13 = vsel %vm179_vm10, %v180_v7, %v171_v5 }
  0x66   :  { %v307_v14 = vsel %vm186_vm11, %v306_v9, %v305_v1 }
  0x67   :  { %v178_v53 = vsel %vm176_vm12, %v163_v22, %v177_v10  ;;  %v310_v16 = vsel %vm617_vm13, %v458_v3, %v307_v14 }
  0x68   :  { %v182_v17 = vsel %vm175_vm14, %v178_v53, %v181_v13  ;;  %v312_v19 = vmul.f32 %v310_v16, %v310_v16 }
  0x69   :  { %v183_v6 = vsel %vm172_vm15, nan, %v182_v17 }
  0x6a   :  { %v313_v36 = vmul.f32 -0.001358992, %v312_v19  ;;  %v320_v18 = vmul.f32 -0.00019511016, %v312_v19  ;;  %339 = vst [vmem:[#allocation5] sm:$0xff] %v183_v6 }
  0x6c   :  { %v314_v24 = vadd.f32 0.041655596, %v313_v36  ;;  %v321_v26 = vadd.f32 0.008332121, %v320_v18 }
  0x6e   :  { %v315_v27 = vmul.f32 %v314_v24, %v312_v19  ;;  %v322_v56 = vmul.f32 %v321_v26, %v312_v19 }
  0x70   :  { %v316_v61 = vadd.f32 -0.4999988, %v315_v27  ;;  %v323_v20 = vadd.f32 -0.16666654, %v322_v56 }
  0x72   :  { %v317_v30 = vmul.f32 %v316_v61, %v312_v19  ;;  %v324_v32 = vmul.f32 %v323_v20, %v312_v19 }
  0x74   :  { %v318_v34 = vadd.f32 1.0, %v317_v30  ;;  %v325_v37 = vadd.f32 1.0, %v324_v32 }
  0x76   :  { %v326_v38 = vmul.f32 %v325_v37, %v310_v16  ;;  %v335_v29 = vxor.u32 2147483648, %v318_v34 }
  0x78   :  { %v332_v39 = vxor.u32 2147483648, %v326_v38  ;;  %v336_v41 = vsel %vm334_vm0, %v335_v29, %v326_v38 }
  0x7a   :  { %v333_v25 = vsel %vm331_vm1, %v318_v34, %v332_v39 }
  0x7b   :  { %v337_v47 = vsel %vm330_vm2, %v333_v25, %v336_v41 }
  0x7c   :  { %v338_v35 = vsel %vm327_vm3, nan, %v337_v47 }
  0x7d   :  { %340 = vst [vmem:[#allocation5 + $0x8] sm:$0xff] %v338_v35 }
  0x7e   :  { %353 = dma.vmem_to_hbm [thread:$0]  %s346_s13, 256, %s348_s16, [#allocation4], %s430_s11, %s430_s11, %s431_s12  }
  0x7f   :  { %427 = dma.done.wait [#allocation4], 256  }
  0x80   :  { %428 = vsyncadd [#allocation4], 4294967040 }
  0x81   :  { %358 = vsyncpa [#allocation3], 1 }
  0x82   :  { %359 = vsyncpa [#allocation4], 1 }

</bundles_post_ra>
